<compile_context>
chip_gen: v7x
topology: tpu7x:2x2x1
jax: 0.10.0
libtpu: 0.0.40
codegen_flags: <defaults>
</compile_context>

<pallas_src>
import math

import jax
import jax.numpy as jnp
from jax.experimental import pallas as pl
from jax.experimental.pallas import tpu as pltpu


def _layer_scale_kernel(x_ref, g_ref, o_ref):
    # Pure VPU elementwise multiply; the (1, L) gamma block broadcasts over the rows.
    o_ref[...] = x_ref[...] * g_ref[...]


def _ceil_div(a: int, b: int) -> int:
    return -(-a // b)


def _sublane_multiple(dtype) -> int:
    # Second-to-last block-dim alignment: 8 for 4-byte, 16 for 2-byte, 32 for 1-byte dtypes.
    return {4: 8, 2: 16, 1: 32}.get(jnp.dtype(dtype).itemsize, 8)


def _vmem_capacity_bytes() -> int:
    try:
        return int(pltpu.get_tpu_info().vmem_capacity_bytes)
    except Exception:
        return 64 * 1024 * 1024  # conservative default (v7x-sized VMEM)


def _choose_view(total: int, d: int, itemsize: int) -> tuple[int, int]:
    """Pick a (rows, L) view of the flat tensor with rows * L == total and L % d == 0.

    Preference order:
      1. L a multiple of 128   -> unmasked full-lane vst (biggest measured lever),
      2. rows >= 8             -> full 8-sublane vregs,
      3. larger L (capped ~16 KiB/row) -> lane-dense stores and a tiny masked fraction
         even when (1) is impossible (e.g. odd sequence lengths with small D).
    Worst case (no usable factorization) degrades to the natural (total//d, d) view.
    """
    rows_nat = total // d
    max_l_elems = max(d, (16 * 1024) // itemsize)
    max_k = max(1, max_l_elems // d)
    best_score, best = None, (rows_nat, d)
    for k in range(1, max_k + 1):
        if rows_nat % k != 0:
            continue
        L = k * d
        rows = rows_nat // k
        score = (L % 128 == 0, rows >= 8, L)
        if best_score is None or score > best_score:
            best_score, best = score, (rows, L)
    return best


def _choose_block_rows(rows2d: int, row_bytes: int, sub: int, target_block_bytes: int) -> int:
    """Largest sublane-aligned row tile under the per-block byte budget, then adjusted
    (best effort) so the grid length is even for v7x's two TensorCores."""
    max_rows = max(sub, (target_block_bytes // max(row_bytes, 1)) // sub * sub)
    block_rows = rows2d if max_rows >= rows2d else max_rows

    nblk = _ceil_div(rows2d, block_rows)
    if nblk % 2 == 1 and rows2d >= 2 * sub:
        for target in range(nblk + 1, nblk + 9):
            if target % 2:
                continue
            cand = _ceil_div(rows2d, target)       # ceil(rows2d / target)
            cand = _ceil_div(cand, sub) * sub      # round up to a sublane multiple
            cand = max(cand, sub)
            if cand < rows2d and _ceil_div(rows2d, cand) % 2 == 0:
                return cand
    return block_rows


def layer_scale(x: jax.Array, gamma: jax.Array, *, inplace: bool = False,
                target_block_bytes: int | None = None) -> jax.Array:
    """x: (..., D), gamma: (D,). Returns x * gamma with identical shape/dtype."""
    orig_shape = x.shape
    D = orig_shape[-1]
    assert gamma.shape == (D,), f"gamma must be ({D},), got {gamma.shape}"
    dtype = x.dtype
    assert jnp.issubdtype(dtype, jnp.floating), "layer_scale expects a floating activation dtype"

    itemsize = jnp.dtype(dtype).itemsize
    total = math.prod(orig_shape)
    if total == 0:
        return x  # degenerate input: avoid an empty-grid pallas_call

    # ---- Lane-dense 2-D view and resident gamma tile (free layout plumbing, no pad) ----
    rows2d, L = _choose_view(total, D, itemsize)
    reps = L // D
    x2 = x.reshape(rows2d, L)
    g2 = jnp.tile(gamma.astype(dtype), reps).reshape(1, L)   # native-dtype multiply in kernel

    # ---- Per-generation block sizing against double-buffered in+out VMEM ----
    vmem_cap = _vmem_capacity_bytes()
    if target_block_bytes is None:
        # ~16 MiB blocks on 128 MiB-VMEM parts (v5e/v6e), ~10 MiB on 64 MiB parts (v7x):
        # amortizes the ~0.35 us/step pipeline overhead while keeping 4 x block (+ gamma
        # + Mosaic scratch) comfortably inside VMEM on every generation.
        target_block_bytes = (16 << 20) if vmem_cap >= (100 << 20) else (10 << 20)
    vmem_limit = min(int(vmem_cap * 0.8), 4 * target_block_bytes + (16 << 20))

    sub = _sublane_multiple(dtype)
    block_rows = _choose_block_rows(rows2d, L * itemsize, sub, target_block_bytes)
    grid = (_ceil_div(rows2d, block_rows),)   # ragged tail clipped by Pallas, no pad/slice

    cost = pl.CostEstimate(flops=total, transcendentals=0,
                           bytes_accessed=2 * total * itemsize + L * itemsize)

    out = pl.pallas_call(
        _layer_scale_kernel,
        out_shape=jax.ShapeDtypeStruct((rows2d, L), dtype),
        grid_spec=pltpu.PrefetchScalarGridSpec(
            num_scalar_prefetch=0,
            grid=grid,
            in_specs=[
                pl.BlockSpec((block_rows, L), lambda i: (i, 0)),
                pl.BlockSpec((1, L), lambda i: (0, 0)),   # gamma stays resident in VMEM
            ],
            out_specs=pl.BlockSpec((block_rows, L), lambda i: (i, 0)),
        ),
        compiler_params=pltpu.CompilerParams(
            dimension_semantics=("parallel",),            # shardable across v7x's 2 TCs
            vmem_limit_bytes=vmem_limit,
        ),
        cost_estimate=cost,
        # PyTorch `inplace=True` path: write through x's buffer when the caller donates x.
        # TODO(synk): without donation XLA inserts a defensive copy, so default is False.
        input_output_aliases=({0: 0} if inplace else {}),
    )(x2, g2)

    return out.reshape(orig_shape)


if __name__ == "__main__":
    # Module config: LayerScale(dim=32, init_values=1e-5); x is (B, N, D) channels-last.
    B, N, D = 2, 8, 32
    init_values = 1e-5

    key = jax.random.PRNGKey(0)
    x = jax.random.normal(key, (B, N, D), dtype=jnp.float32)

    # Deterministic parameter init, matching nn.Parameter(init_values * torch.ones(dim)).
    gamma = init_values * jnp.ones((D,), dtype=jnp.float32)

    out = jax.block_until_ready(layer_scale(x, gamma))

    # Correctness check vs. a plain-JAX reference of the PyTorch forward.
    ref = x * gamma
    assert out.shape == x.shape and out.dtype == x.dtype
    assert jnp.allclose(out, ref, atol=1e-7, rtol=1e-6)
    print("KERNEL_OK")
</pallas_src>

<mosaic_0001>
module attributes {stable_mosaic.version = 11 : i64} {
  func.func @_layer_scale_kernel(%arg0: i32, %arg1: memref<1x512xf32, #tpu.memory_space<vmem>>, %arg2: memref<1x512xf32, #tpu.memory_space<vmem>>, %arg3: memref<1x512xf32, #tpu.memory_space<vmem>>) attributes {dimension_semantics = [#tpu.dimension_semantics<parallel>], iteration_bounds = array<i64: 1>, scalar_prefetch = 0 : i64, scratch_operands = 0 : i64, tpu.core_type = #tpu.core_type<tc>, window_params = [{transform_indices = @transform_0, window_bounds = array<i64: 1, 512>}, {pipeline_mode = #tpu.pipeline_mode<synchronous>, transform_indices = @transform_1, window_bounds = array<i64: 1, 512>}, {transform_indices = @transform_2, window_bounds = array<i64: 1, 512>}]} {
    %c0 = arith.constant 0 : index
    %c0_0 = arith.constant 0 : index
    %0 = vector.load %arg1[%c0, %c0_0] : memref<1x512xf32, #tpu.memory_space<vmem>>, vector<1x512xf32>
    %c0_1 = arith.constant 0 : index
    %c0_2 = arith.constant 0 : index
    %1 = vector.load %arg2[%c0_1, %c0_2] : memref<1x512xf32, #tpu.memory_space<vmem>>, vector<1x512xf32>
    %2 = arith.mulf %0, %1 : vector<1x512xf32>
    %c0_3 = arith.constant 0 : index
    %c0_4 = arith.constant 0 : index
    %3 = vector.load %arg3[%c0_3, %c0_4] : memref<1x512xf32, #tpu.memory_space<vmem>>, vector<1x512xf32>
    tpu.vector_store %arg3[%c0_3, %c0_4], %2 {strides = array<i32>} : memref<1x512xf32, #tpu.memory_space<vmem>>, vector<1x512xf32>,
    return
  }
  func.func @transform_0(%arg0: i32) -> (i32, i32) {
    %c0_i32 = arith.constant 0 : i32
    %c0_i32_0 = arith.constant 0 : i32
    return %arg0, %c0_i32 : i32, i32
  }
  func.func @transform_1(%arg0: i32) -> (i32, i32) {
    %c0_i32 = arith.constant 0 : i32
    %c0_i32_0 = arith.constant 0 : i32
    %c0_i32_1 = arith.constant 0 : i32
    return %c0_i32, %c0_i32_0 : i32, i32
  }
  func.func @transform_2(%arg0: i32) -> (i32, i32) {
    %c0_i32 = arith.constant 0 : i32
    %c0_i32_0 = arith.constant 0 : i32
    return %arg0, %c0_i32 : i32, i32
  }
}

</mosaic_0001>

<bundles_post_ra>
// kernel: tpu_custom_call.1
= control target key start
LH: loop header
LB: loop body
LE: loop exit
PB: predicated region body
PF: predicated region fallthrough
CT: control target
= control target key end

     0   :  { %7 = vsyncpa [#allocation3], 0  ;;  %s189_s0 = inlined_call_operand.hbm [shape: f32[1,512], index: 0, kind: input, shape index: {}]   ;;  %s190_s1 = inlined_call_operand.hbm [shape: f32[1,512], index: 1, kind: input, shape index: {}]   ;;  %s191_s2 = inlined_call_operand.hbm [shape: f32[1,512], index: 2, kind: output, shape index: {}]  }
   0x1   :  { %8 = vsyncpa [#allocation6], 0 }
   0x2   :  { %9 = vsyncpa [#allocation4], 0  ;;  %s135_s9 = smov [#allocation2]   ;;  %s136_s11 = smov [#allocation5]  }
   0x3   :  { %s16_s10 = sshll.u32 %s135_s9, 4  ;;  %s26_s12 = sshll.u32 %s136_s11, 4  ;;  %s17_s10 = int_to_ptr.vmem [resolvable:$true] %s16_s10  ;;  %s27_s12 = int_to_ptr.vmem [resolvable:$true] %s26_s12 }
   0x4   :  { %s63_s15 = scalar_lea.hbm %s189_s0, 64 }
   0x5   :  { %p64_p0 = scmp.ne.s32.totalorder %s189_s0, %s63_s15  ;;  %p67_p1 = scmp.lt.u32.totalorder %s63_s15, %s189_s0 }
   0x7   :  { %p69_p2 = pnand %p67_p1, %p64_p0 }
   0x9   :  { %72 = shalt.err (!%p69_p2)
}
   0xa   :  { %s73_s20 = scalar_lea.vmem %s17_s10, 64  ;;  %p78_p4 = scmp.lt.s32.totalorder %s17_s10, %s17_s10 }
   0xb   :  { %p74_p3 = scmp.ne.s32.totalorder %s17_s10, %s73_s20  ;;  %p79_p5 = scmp.lt.s32.totalorder %s73_s20, %s73_s20 }
   0xd   :  { %p80_p6 = por %p79_p5, %p78_p4 }
   0xf   :  { %p81_p7 = pnand %p80_p6, %p74_p3 }
  0x11   :  { %84 = shalt.err (!%p81_p7)
}
  0x12   :  { %19 = dma.hbm_to_vmem [thread:$0]  %s189_s0, 64, %s17_s10, [#allocation3]  }
  0x13   :  { %s85_s25 = scalar_lea.hbm %s190_s1, 64 }
  0x14   :  { %p86_p8 = scmp.ne.s32.totalorder %s190_s1, %s85_s25  ;;  %p89_p9 = scmp.lt.u32.totalorder %s85_s25, %s190_s1 }
  0x16   :  { %p91_p10 = pnand %p89_p9, %p86_p8 }
  0x18   :  { %94 = shalt.err (!%p91_p10)
}
  0x19   :  { %s95_s30 = scalar_lea.vmem %s27_s12, 64  ;;  %p100_p12 = scmp.lt.s32.totalorder %s27_s12, %s27_s12 }
  0x1a   :  { %p96_p11 = scmp.ne.s32.totalorder %s27_s12, %s95_s30  ;;  %p101_p13 = scmp.lt.s32.totalorder %s95_s30, %s95_s30 }
  0x1c   :  { %p102_p0 = por %p101_p13, %p100_p12 }
  0x1e   :  { %p103_p1 = pnand %p102_p0, %p96_p11 }
  0x20   :  { %106 = shalt.err (!%p103_p1)
}
  0x21   :  { %29 = dma.hbm_to_vmem [thread:$0]  %s190_s1, 64, %s27_s12, [#allocation6]  }
  0x22   :  { %129 = dma.done.wait [#allocation3], 64  }
  0x23   :  { %130 = vsyncadd [#allocation3], 4294967232 }
  0x24   :  { %131 = dma.done.wait [#allocation6], 64  }
  0x25   :  { %132 = vsyncadd [#allocation6], 4294967232  ;;  %v39_v0 = vlaneseq  ;;  %s137_s4 = smov [#allocation7]   ;;  %v36_v1 = vld [vmem:[#allocation2] sm:$0xf] }
  0x26   :  { %s50_s5 = sshll.u32 %s137_s4, 4  ;;  %v37_v2 = vld [vmem:[#allocation5] sm:$0xf]  ;;  %s51_s5 = int_to_ptr.vmem [resolvable:$true] %s50_s5 }
  0x27   :  { %vm41_vm0 = vcmp.lt.s32.totalorder %v39_v0, 512  ;;  %v38_v3 = vmul.f32 %v37_v2, %v36_v1  ;;  %s107_s6 = scalar_lea.vmem %s51_s5, 64  ;;  %p112_p3 = scmp.lt.s32.totalorder %s51_s5, %s51_s5 }
  0x28   :  { %p108_p2 = scmp.ne.s32.totalorder %s51_s5, %s107_s6  ;;  %p113_p4 = scmp.lt.s32.totalorder %s107_s6, %s107_s6 }
  0x29   :  { %43 = vst.msk [vmem:[#allocation7] sm:$0xf] %vm41_vm0, %v38_v3 }
  0x2a   :  { %p114_p5 = por %p113_p4, %p112_p3 }
  0x2c   :  { %p115_p6 = pnand %p114_p5, %p108_p2 }
  0x2e   :  { %118 = shalt.err (!%p115_p6)
}
  0x2f   :  { %s119_s8 = scalar_lea.hbm %s191_s2, 64 }
  0x30   :  { %p120_p7 = scmp.ne.s32.totalorder %s191_s2, %s119_s8  ;;  %p123_p8 = scmp.lt.u32.totalorder %s119_s8, %s191_s2 }
  0x32   :  { %p125_p9 = pnand %p123_p8, %p120_p7 }
  0x34   :  { %128 = shalt.err (!%p125_p9)
}
  0x35   :  { %53 = dma.vmem_to_hbm [thread:$0]  %s51_s5, 64, %s191_s2, [#allocation4]  }
  0x36   :  { %133 = dma.done.wait [#allocation4], 64  }
  0x37   :  { %134 = vsyncadd [#allocation4], 4294967232 }
  0x38   :  { %57 = vsyncpa [#allocation3], 1 }
  0x39   :  { %58 = vsyncpa [#allocation6], 1 }
  0x3a   :  { %59 = vsyncpa [#allocation4], 1 }

</bundles_post_ra>
